<compile_context>
chip_gen: v6e
topology: v6e:2x2x1
jax: 0.10.0
libtpu: 0.0.40
codegen_flags: <defaults>
</compile_context>

<pallas_src>
import numpy as np

import jax
import jax.numpy as jnp
from jax.experimental import pallas as pl
from jax.experimental.pallas import tpu as pltpu

BN_EPS = 1e-5


def _moe_kernel(x_ref, w1_ref, b1_ref, w2_ref, b2_ref, gate_t_ref,
                rep_e_ref, rep_t_ref, blk_id_ref,
                out_ref, gsm_t_ref):
    """One batch tile of the fused MoE forward.

    x_ref:      (TB, D)
    w1_ref:     (D, E*H1)       concatenated, BN-scale pre-folded
    b1_ref:     (1, E*H1)
    w2_ref:     (E*H1, E*H2)    block-diagonal, BN-scale pre-folded
    b2_ref:     (1, E*H2)
    gate_t_ref: (E, T)          gate logits, transposed (softmax over axis 0)
    rep_e_ref:  (E*H2, E)       static expansion: rep_e[r,e] = [r//H2 == e]
    rep_t_ref:  (T, T*H2)       static expansion: rep_t[t,c] = [c//H2 == t]
    blk_id_ref: (E*H2, T*H2)    static mask:      [r % H2 == c % H2]
    out_ref:    (TB, T*H2)      lane-packed task outputs
    gsm_t_ref:  (1, E, T)       softmaxed gates (transposed), per batch tile
    """
    x = x_ref[...]                                                       # (TB, D)

    # ---- Fused expert MLPs: one lane-dense MXU pass per layer ----
    h1 = jnp.dot(x, w1_ref[...], preferred_element_type=jnp.float32) + b1_ref[...]
    h1 = jnp.maximum(h1, 0.0)                                            # (TB, E*H1)
    h2 = jnp.dot(h1, w2_ref[...], preferred_element_type=jnp.float32) + b2_ref[...]
    h2 = jnp.maximum(h2, 0.0)                                            # (TB, E*H2)

    # ---- Gate softmax over experts (logits kept transposed: reduce axis 0) ----
    gt = gate_t_ref[...]                                                 # (E, T)
    m = jnp.max(gt, axis=0, keepdims=True)
    eg = jnp.exp(gt - m)
    inv = pl.reciprocal(jnp.sum(eg, axis=0, keepdims=True))              # (1, T)
    gsm_t = eg * inv                                                     # (E, T)
    gsm_t_ref[0] = gsm_t

    # ---- Gated per-task combination as a single MXU contraction ----
    # Wg = kron(gsm.T, I_H2):  Wg[e*H2+j, t*H2+k] = gsm[t,e] * [j == k]
    g1 = jnp.dot(rep_e_ref[...], gsm_t, preferred_element_type=jnp.float32)   # (E*H2, T)
    gexp = jnp.dot(g1, rep_t_ref[...], preferred_element_type=jnp.float32)    # (E*H2, T*H2)
    wg = gexp * blk_id_ref[...]                                               # (E*H2, T*H2)
    out_ref[...] = jnp.dot(h2, wg, preferred_element_type=jnp.float32)        # (TB, T*H2)


def moe_forward(x, w1, b1, w2, b2, gate_logits, *, block_b=None):
    B, D = x.shape
    E, _, H1 = w1.shape
    _, _, H2 = w2.shape
    T = gate_logits.shape[0]

    if block_b is None:
        block_b = B
    assert B % block_b == 0, "batch must divide evenly into batch tiles"
    nb = B // block_b

    # ---- Host-side parameter preparation (done once per call, outside kernel) ----
    bn_scale = float(1.0 / np.sqrt(1.0 + BN_EPS))       # eval-mode BatchNorm1d fold

    # Concatenate expert W1 along lanes: (D, E*H1); fold BN scale.
    w1c = (jnp.transpose(w1, (1, 0, 2)) * bn_scale).reshape(D, E * H1)
    b1c = (b1 * bn_scale).reshape(1, E * H1)

    # Block-diagonal W2: (E*H1, E*H2); fold BN scale.
    eye_e = jnp.eye(E, dtype=w2.dtype)
    w2bd = (eye_e[:, None, :, None] * (w2 * bn_scale)[:, :, None, :]).reshape(E * H1, E * H2)
    b2c = (b2 * bn_scale).reshape(1, E * H2)

    # Gate logits transposed so the in-kernel softmax reduces along sublanes.
    gate_t = jnp.transpose(gate_logits)                  # (E, T)

    # Static expansion/selection constants for Wg = kron(gsm.T, I_H2).
    rep_e = jnp.asarray(
        (np.arange(E * H2)[:, None] // H2 == np.arange(E)[None, :]), jnp.float32)      # (E*H2, E)
    rep_t = jnp.asarray(
        (np.arange(T)[:, None] == np.arange(T * H2)[None, :] // H2), jnp.float32)      # (T, T*H2)
    blk_id = jnp.asarray(
        (np.arange(E * H2)[:, None] % H2 == np.arange(T * H2)[None, :] % H2),
        jnp.float32)                                                                    # (E*H2, T*H2)

    out_flat, gsm_t_all = pl.pallas_call(
        _moe_kernel,
        grid=(nb,),
        in_specs=[
            pl.BlockSpec((block_b, D), lambda i: (i, 0)),          # x: batch-tiled
            pl.BlockSpec((D, E * H1), lambda i: (0, 0)),           # W1 concat (resident)
            pl.BlockSpec((1, E * H1), lambda i: (0, 0)),
            pl.BlockSpec((E * H1, E * H2), lambda i: (0, 0)),      # W2 block-diag (resident)
            pl.BlockSpec((1, E * H2), lambda i: (0, 0)),
            pl.BlockSpec((E, T), lambda i: (0, 0)),                # gate logits^T
            pl.BlockSpec((E * H2, E), lambda i: (0, 0)),
            pl.BlockSpec((T, T * H2), lambda i: (0, 0)),
            pl.BlockSpec((E * H2, T * H2), lambda i: (0, 0)),
        ],
        out_specs=[
            pl.BlockSpec((block_b, T * H2), lambda i: (i, 0)),     # lane-packed task outputs
            pl.BlockSpec((1, E, T), lambda i: (i, 0, 0)),          # per-tile gate softmax
        ],
        out_shape=[
            jax.ShapeDtypeStruct((B, T * H2), jnp.float32),
            jax.ShapeDtypeStruct((nb, E, T), jnp.float32),
        ],
        compiler_params=pltpu.CompilerParams(
            dimension_semantics=("parallel",)),                    # shard batch tiles on v7x
    )(x, w1c, b1c, w2bd, b2c, gate_t, rep_e, rep_t, blk_id)

    # Unpack lane-dense slabs back into the module's output layout.
    out = jnp.transpose(out_flat.reshape(B, T, H2), (1, 0, 2))     # (T, B, H2)
    gsm = jnp.transpose(gsm_t_all[0])                              # (T, E)
    return out, gsm


def reference(x, w1, b1, w2, b2, gate_logits):
    """Pure-JAX reference mirroring MOELayer.forward (eval mode)."""
    bn_scale = 1.0 / jnp.sqrt(1.0 + BN_EPS)
    outs = []
    for e in range(w1.shape[0]):
        h = jnp.maximum((x @ w1[e] + b1[e]) * bn_scale, 0.0)
        h = jnp.maximum((h @ w2[e] + b2[e]) * bn_scale, 0.0)
        outs.append(h)
    stacked = jnp.stack(outs, axis=2)                # (B, H2, E) == torch.stack(..., 2)
    gsm = jax.nn.softmax(gate_logits, axis=-1)       # (T, E)
    task_outs = [jnp.sum(stacked * gsm[t], axis=2) for t in range(gate_logits.shape[0])]
    return jnp.stack(task_outs, axis=0), gsm


if __name__ == "__main__":
    # Small shapes consistent with MOELayer(input_dim=32, num_tasks=2,
    # num_experts=4, dnn_hidden_units=(32, 32), dr=0.0).  E*H1 = 128 lanes.
    B, D = 8, 32
    H1, H2 = 32, 32
    E, T = 4, 2

    key = jax.random.PRNGKey(0)
    k0, k1, k2, k3 = jax.random.split(key, 4)

    x = jax.random.normal(k0, (B, D), jnp.float32)
    # Synthetic parameter init (module uses normal(std=init_std) weights + zero
    # biases; std=0.1 for non-trivial activations).
    w1 = jax.random.normal(k1, (E, D, H1), jnp.float32) * 0.1
    b1 = jnp.zeros((E, 1, H1), jnp.float32)
    w2 = jax.random.normal(k2, (E, H1, H2), jnp.float32) * 0.1
    b2 = jnp.zeros((E, 1, H2), jnp.float32)
    gate_logits = jax.random.uniform(k3, (T, E), jnp.float32)  # torch.rand analogue

    out, gsm = moe_forward(x, w1, b1, w2, b2, gate_logits)
    jax.block_until_ready((out, gsm))

    ref_out, ref_gsm = reference(x, w1, b1, w2, b2, gate_logits)
    assert out.shape == (T, B, H2) and gsm.shape == (T, E)
    assert jnp.allclose(out, ref_out, atol=1e-4, rtol=1e-4), "task outputs mismatch"
    assert jnp.allclose(gsm, ref_gsm, atol=1e-5, rtol=1e-5), "gate softmax mismatch"

    # task outputs list + gate dict, mirroring the torch return structure
    outputs = [out[t] for t in range(T)]
    gate_list = {t: gsm[t] for t in range(T)}
    del outputs, gate_list

    print("KERNEL_OK")
</pallas_src>

<mosaic_0001>
module attributes {stable_mosaic.version = 11 : i64} {
  func.func @_moe_kernel(%arg0: i32, %arg1: memref<8x32xf32, #tpu.memory_space<vmem>>, %arg2: memref<32x128xf32, #tpu.memory_space<vmem>>, %arg3: memref<1x128xf32, #tpu.memory_space<vmem>>, %arg4: memref<128x128xf32, #tpu.memory_space<vmem>>, %arg5: memref<1x128xf32, #tpu.memory_space<vmem>>, %arg6: memref<4x2xf32, #tpu.memory_space<vmem>>, %arg7: memref<128x4xf32, #tpu.memory_space<vmem>>, %arg8: memref<2x64xf32, #tpu.memory_space<vmem>>, %arg9: memref<128x64xf32, #tpu.memory_space<vmem>>, %arg10: memref<8x64xf32, #tpu.memory_space<vmem>>, %arg11: memref<1x4x2xf32, #tpu.memory_space<vmem>>) attributes {dimension_semantics = [#tpu.dimension_semantics<parallel>], iteration_bounds = array<i64: 1>, scalar_prefetch = 0 : i64, scratch_operands = 0 : i64, tpu.core_type = #tpu.core_type<tc>, window_params = [{transform_indices = @transform_0, window_bounds = array<i64: 8, 32>}, {pipeline_mode = #tpu.pipeline_mode<synchronous>, transform_indices = @transform_1, window_bounds = array<i64: 32, 128>}, {pipeline_mode = #tpu.pipeline_mode<synchronous>, transform_indices = @transform_2, window_bounds = array<i64: 1, 128>}, {pipeline_mode = #tpu.pipeline_mode<synchronous>, transform_indices = @transform_3, window_bounds = array<i64: 128, 128>}, {pipeline_mode = #tpu.pipeline_mode<synchronous>, transform_indices = @transform_4, window_bounds = array<i64: 1, 128>}, {pipeline_mode = #tpu.pipeline_mode<synchronous>, transform_indices = @transform_5, window_bounds = array<i64: 4, 2>}, {pipeline_mode = #tpu.pipeline_mode<synchronous>, transform_indices = @transform_6, window_bounds = array<i64: 128, 4>}, {pipeline_mode = #tpu.pipeline_mode<synchronous>, transform_indices = @transform_7, window_bounds = array<i64: 2, 64>}, {pipeline_mode = #tpu.pipeline_mode<synchronous>, transform_indices = @transform_8, window_bounds = array<i64: 128, 64>}, {transform_indices = @transform_9, window_bounds = array<i64: 8, 64>}, {transform_indices = @transform_10, window_bounds = array<i64: 1, 4, 2>}]} {
    %c0 = arith.constant 0 : index
    %c0_0 = arith.constant 0 : index
    %0 = vector.load %arg1[%c0, %c0_0] : memref<8x32xf32, #tpu.memory_space<vmem>>, vector<8x32xf32>
    %c0_1 = arith.constant 0 : index
    %c0_2 = arith.constant 0 : index
    %1 = vector.load %arg2[%c0_1, %c0_2] : memref<32x128xf32, #tpu.memory_space<vmem>>, vector<32x128xf32>
    %cst = arith.constant dense<0.000000e+00> : vector<8x128xf32>
    %2 = tpu.matmul %0, %1, %cst {dimension_numbers = #tpu.dot_dimension_numbers<[1], [0], [0], [1], [0, 0, 1, 1], [], []>} : vector<8x32xf32>, vector<32x128xf32>, vector<8x128xf32> -> vector<8x128xf32>
    %c0_3 = arith.constant 0 : index
    %c0_4 = arith.constant 0 : index
    %3 = vector.load %arg3[%c0_3, %c0_4] : memref<1x128xf32, #tpu.memory_space<vmem>>, vector<1x128xf32>
    %4 = vector.broadcast %3 : vector<1x128xf32> to vector<8x128xf32>
    %5 = arith.addf %2, %4 : vector<8x128xf32>
    %cst_5 = arith.constant 0.000000e+00 : f32
    %6 = vector.broadcast %cst_5 : f32 to vector<8x128xf32>
    %7 = arith.maximumf %5, %6 : vector<8x128xf32>
    %c0_6 = arith.constant 0 : index
    %c0_7 = arith.constant 0 : index
    %8 = vector.load %arg4[%c0_6, %c0_7] : memref<128x128xf32, #tpu.memory_space<vmem>>, vector<128x128xf32>
    %cst_8 = arith.constant dense<0.000000e+00> : vector<8x128xf32>
    %9 = tpu.matmul %7, %8, %cst_8 {dimension_numbers = #tpu.dot_dimension_numbers<[1], [0], [0], [1], [0, 0, 1, 1], [], []>} : vector<8x128xf32>, vector<128x128xf32>, vector<8x128xf32> -> vector<8x128xf32>
    %c0_9 = arith.constant 0 : index
    %c0_10 = arith.constant 0 : index
    %10 = vector.load %arg5[%c0_9, %c0_10] : memref<1x128xf32, #tpu.memory_space<vmem>>, vector<1x128xf32>
    %11 = vector.broadcast %10 : vector<1x128xf32> to vector<8x128xf32>
    %12 = arith.addf %9, %11 : vector<8x128xf32>
    %cst_11 = arith.constant 0.000000e+00 : f32
    %13 = vector.broadcast %cst_11 : f32 to vector<8x128xf32>
    %14 = arith.maximumf %12, %13 : vector<8x128xf32>
    %c0_12 = arith.constant 0 : index
    %c0_13 = arith.constant 0 : index
    %15 = vector.load %arg6[%c0_12, %c0_13] : memref<4x2xf32, #tpu.memory_space<vmem>>, vector<4x2xf32>
    %cst_14 = arith.constant dense<0xFF800000> : vector<2xf32>
    %16 = vector.multi_reduction <maximumf>, %15, %cst_14 [0] : vector<4x2xf32> to vector<2xf32>
    %17 = vector.shape_cast %16 : vector<2xf32> to vector<1x2xf32>
    %18 = vector.broadcast %17 : vector<1x2xf32> to vector<4x2xf32>
    %19 = arith.subf %15, %18 : vector<4x2xf32>
    %20 = math.exp %19 : vector<4x2xf32>
    %cst_15 = arith.constant dense<0.000000e+00> : vector<2xf32>
    %21 = vector.multi_reduction <add>, %20, %cst_15 [0] : vector<4x2xf32> to vector<2xf32>
    %22 = vector.shape_cast %21 : vector<2xf32> to vector<1x2xf32>
    %23 = tpu.reciprocal %22 : vector<1x2xf32> -> vector<1x2xf32>
    %24 = vector.broadcast %23 : vector<1x2xf32> to vector<4x2xf32>
    %25 = arith.mulf %20, %24 : vector<4x2xf32>
    %c0_16 = arith.constant 0 : index
    %c0_17 = arith.constant 0 : index
    %c0_18 = arith.constant 0 : index
    %26 = vector.load %arg11[%c0_16, %c0_17, %c0_18] : memref<1x4x2xf32, #tpu.memory_space<vmem>>, vector<1x4x2xf32>
    %27 = vector.shape_cast %26 : vector<1x4x2xf32> to vector<4x2xf32>
    %28 = vector.shape_cast %25 : vector<4x2xf32> to vector<1x4x2xf32>
    tpu.vector_store %arg11[%c0_16, %c0_17, %c0_18], %28 {strides = array<i32>} : memref<1x4x2xf32, #tpu.memory_space<vmem>>, vector<1x4x2xf32>,
    %c0_19 = arith.constant 0 : index
    %c0_20 = arith.constant 0 : index
    %29 = vector.load %arg7[%c0_19, %c0_20] : memref<128x4xf32, #tpu.memory_space<vmem>>, vector<128x4xf32>
    %cst_21 = arith.constant dense<0.000000e+00> : vector<128x2xf32>
    %30 = tpu.matmul %29, %25, %cst_21 {dimension_numbers = #tpu.dot_dimension_numbers<[1], [0], [0], [1], [0, 0, 1, 1], [], []>} : vector<128x4xf32>, vector<4x2xf32>, vector<128x2xf32> -> vector<128x2xf32>
    %c0_22 = arith.constant 0 : index
    %c0_23 = arith.constant 0 : index
    %31 = vector.load %arg8[%c0_22, %c0_23] : memref<2x64xf32, #tpu.memory_space<vmem>>, vector<2x64xf32>
    %cst_24 = arith.constant dense<0.000000e+00> : vector<128x64xf32>
    %32 = tpu.matmul %30, %31, %cst_24 {dimension_numbers = #tpu.dot_dimension_numbers<[1], [0], [0], [1], [0, 0, 1, 1], [], []>} : vector<128x2xf32>, vector<2x64xf32>, vector<128x64xf32> -> vector<128x64xf32>
    %c0_25 = arith.constant 0 : index
    %c0_26 = arith.constant 0 : index
    %33 = vector.load %arg9[%c0_25, %c0_26] : memref<128x64xf32, #tpu.memory_space<vmem>>, vector<128x64xf32>
    %34 = arith.mulf %32, %33 : vector<128x64xf32>
    %cst_27 = arith.constant dense<0.000000e+00> : vector<8x64xf32>
    %35 = tpu.matmul %14, %34, %cst_27 {dimension_numbers = #tpu.dot_dimension_numbers<[1], [0], [0], [1], [0, 0, 1, 1], [], []>} : vector<8x128xf32>, vector<128x64xf32>, vector<8x64xf32> -> vector<8x64xf32>
    %c0_28 = arith.constant 0 : index
    %c0_29 = arith.constant 0 : index
    %36 = vector.load %arg10[%c0_28, %c0_29] : memref<8x64xf32, #tpu.memory_space<vmem>>, vector<8x64xf32>
    tpu.vector_store %arg10[%c0_28, %c0_29], %35 {strides = array<i32>} : memref<8x64xf32, #tpu.memory_space<vmem>>, vector<8x64xf32>,
    return
  }
  func.func @transform_0(%arg0: i32) -> (i32, i32) {
    %c0_i32 = arith.constant 0 : i32
    %c0_i32_0 = arith.constant 0 : i32
    return %arg0, %c0_i32 : i32, i32
  }
  func.func @transform_1(%arg0: i32) -> (i32, i32) {
    %c0_i32 = arith.constant 0 : i32
    %c0_i32_0 = arith.constant 0 : i32
    %c0_i32_1 = arith.constant 0 : i32
    return %c0_i32, %c0_i32_0 : i32, i32
  }
  func.func @transform_2(%arg0: i32) -> (i32, i32) {
    %c0_i32 = arith.constant 0 : i32
    %c0_i32_0 = arith.constant 0 : i32
    %c0_i32_1 = arith.constant 0 : i32
    return %c0_i32, %c0_i32_0 : i32, i32
  }
  func.func @transform_3(%arg0: i32) -> (i32, i32) {
    %c0_i32 = arith.constant 0 : i32
    %c0_i32_0 = arith.constant 0 : i32
    %c0_i32_1 = arith.constant 0 : i32
    return %c0_i32, %c0_i32_0 : i32, i32
  }
  func.func @transform_4(%arg0: i32) -> (i32, i32) {
    %c0_i32 = arith.constant 0 : i32
    %c0_i32_0 = arith.constant 0 : i32
    %c0_i32_1 = arith.constant 0 : i32
    return %c0_i32, %c0_i32_0 : i32, i32
  }
  func.func @transform_5(%arg0: i32) -> (i32, i32) {
    %c0_i32 = arith.constant 0 : i32
    %c0_i32_0 = arith.constant 0 : i32
    %c0_i32_1 = arith.constant 0 : i32
    return %c0_i32, %c0_i32_0 : i32, i32
  }
  func.func @transform_6(%arg0: i32) -> (i32, i32) {
    %c0_i32 = arith.constant 0 : i32
    %c0_i32_0 = arith.constant 0 : i32
    %c0_i32_1 = arith.constant 0 : i32
    return %c0_i32, %c0_i32_0 : i32, i32
  }
  func.func @transform_7(%arg0: i32) -> (i32, i32) {
    %c0_i32 = arith.constant 0 : i32
    %c0_i32_0 = arith.constant 0 : i32
    %c0_i32_1 = arith.constant 0 : i32
    return %c0_i32, %c0_i32_0 : i32, i32
  }
  func.func @transform_8(%arg0: i32) -> (i32, i32) {
    %c0_i32 = arith.constant 0 : i32
    %c0_i32_0 = arith.constant 0 : i32
    %c0_i32_1 = arith.constant 0 : i32
    return %c0_i32, %c0_i32_0 : i32, i32
  }
  func.func @transform_9(%arg0: i32) -> (i32, i32) {
    %c0_i32 = arith.constant 0 : i32
    %c0_i32_0 = arith.constant 0 : i32
    return %arg0, %c0_i32 : i32, i32
  }
  func.func @transform_10(%arg0: i32) -> (i32, i32, i32) {
    %c0_i32 = arith.constant 0 : i32
    %c0_i32_0 = arith.constant 0 : i32
    %c0_i32_1 = arith.constant 0 : i32
    return %arg0, %c0_i32, %c0_i32_0 : i32, i32, i32
  }
}

</mosaic_0001>

<bundles_post_ra>
// kernel: tpu_custom_call.1
= control target key start
LH: loop header
LB: loop body
LE: loop exit
PB: predicated region body
PF: predicated region fallthrough
CT: control target
= control target key end

     0   :  { %v1045_v1 = vmov 0.0   ;;  %vm1046_vm0 = vmmov 0   ;;  %vm217_vm1 = vcmask 11264   ;;  %vm47_vm2 = vcmask 261120   ;;  %s1372_s0 = inlined_call_operand.vmem [shape: f32[8,32], index: 0, kind: input, shape index: {}]   ;;  %s1373_s1 = inlined_call_operand.vmem [shape: f32[32,128], index: 1, kind: input, shape index: {}]   ;;  %s1374_s2 = inlined_call_operand.vmem [shape: f32[1,128], index: 2, kind: input, shape index: {}]   ;;  %s1375_s3 = inlined_call_operand.vmem [shape: f32[128,128], index: 3, kind: input, shape index: {}]   ;;  %s1376_s4 = inlined_call_operand.vmem [shape: f32[1,128], index: 4, kind: input, shape index: {}]   ;;  %s1377_s5 = inlined_call_operand.vmem [shape: f32[4,2], index: 5, kind: input, shape index: {}]   ;;  %s1378_s6 = inlined_call_operand.vmem [shape: f32[128,4], index: 6, kind: input, shape index: {}]   ;;  %s1379_s7 = inlined_call_operand.vmem [shape: f32[2,64], index: 7, kind: input, shape index: {}]   ;;  %s1380_s8 = inlined_call_operand.vmem [shape: f32[128,64], index: 8, kind: input, shape index: {}]   ;;  %s1381_s9 = inlined_call_operand.hbm [shape: f32[8,64], index: 9, kind: output, shape index: {0}]   ;;  %s1382_s10 = inlined_call_operand.vmem [shape: f32[1,4,2], index: 10, kind: output, shape index: {1}]  }
   0x1   :  { %v39_v0 = vld [vmem:[%s1373_s1 + $0x18] sm:$0xff]  ;;  %883 = vmatprep.subr.mxu0 %v1045_v1  ;;  %v38_v2 = vld [vmem:[%s1373_s1 + $0x10] sm:$0xff]  ;;  %891 = vmatprep.mubr.msk.f32.mxu0 %vm1046_vm0, %v1045_v1  ;;  %v216_v3 = vld [vmem:[%s1377_s5] sm:$0xf]  ;;  %vm254_vm3 = vcmask 31744  }
   0x2   :  { %884 = vmatpush3.msra.mxu0 %v39_v0  ;;  %v218_v4 = vsel %vm217_vm1, %v216_v3, -inf  ;;  %894 = vmatprep.subr.mxu1 %v1045_v1  ;;  %v37_v5 = vld [vmem:[%s1373_s1 + $0x8] sm:$0xff]  ;;  %v36_v7 = vld [vmem:[%s1373_s1] sm:$0xff]  ;;  %v137_v12 = vld [vmem:[%s1375_s3 + $0x78] sm:$0xff] }
   0x3   :  { %885 = vmatprep.subr.mxu0 %v1045_v1  ;;  %v219_v6 = vrot.slane %v218_v4, 4  ;;  %926 = vmatprep.mubr.msk.f32.mxu1 %vm1046_vm0, %v1045_v1  ;;  %v35_v9 = vld [vmem:[%s1372_s0] sm:$0xff]  ;;  %v136_v13 = vld [vmem:[%s1375_s3 + $0x70] sm:$0xff]  ;;  %v135_v15 = vld [vmem:[%s1375_s3 + $0x68] sm:$0xff] }
   0x4   :  { %886 = vmatpush3.msra.mxu0 %v38_v2  ;;  %v238_v11 = vld [vmem:[%s1378_s6] sm:$0xff]  ;;  %895 = vmatpush3.msra.mxu1 %v137_v12 }
   0x5   :  { %887 = vmatprep.subr.mxu0 %v1045_v1  ;;  %v220_v8 = vmax.f32 %v218_v4, %v219_v6  ;;  %896 = vmatprep.subr.mxu1 %v1045_v1  ;;  %v134_v17 = vld [vmem:[%s1375_s3 + $0x60] sm:$0xff] }
   0x6   :  { %888 = vmatpush3.msra.mxu0 %v37_v5  ;;  %897 = vmatpush3.msra.mxu1 %v136_v13 }
   0x7   :  { %889 = vmatprep.subr.mxu0 %v1045_v1  ;;  %v221_v10 = vrot.slane %v220_v8, 2  ;;  %898 = vmatprep.subr.mxu1 %v1045_v1 }
   0x8   :  { %890 = vmatpush3.msra.mxu0 %v36_v7  ;;  %899 = vmatpush3.msra.mxu1 %v135_v15 }
   0x9   :  { %892 = vmatmul.mubr.msk.f32.vlgmr.msra.gmra.mxu0 %vm47_vm2, %v35_v9  ;;  %v222_v14 = vmax.f32 %v220_v8, %v221_v10 }
   0xa   :  { %931 = vmatprep.mubr.msk.f32.mxu0 %vm254_vm3, %v238_v11 }
   0xb   :  { %v223_v16 = vrot.slane %v222_v14, 1 }
   0xc   :  { %16 = vsyncpa [#allocation3], 0  ;;  %900 = vmatprep.subr.mxu1 %v1045_v1  ;;  %v133_v19 = vld [vmem:[%s1375_s3 + $0x58] sm:$0xff]  ;;  %v132_v21 = vld [vmem:[%s1375_s3 + $0x50] sm:$0xff]  ;;  %vm303_vm4 = vcmask 1043456   ;;  %vm502_vm5 = vcmask 1041408  }
   0xd   :  { %v224_v18 = vmax.f32 %v222_v14, %v223_v16  ;;  %901 = vmatpush3.msra.mxu1 %v134_v17  ;;  %v131_v23 = vld [vmem:[%s1375_s3 + $0x48] sm:$0xff]  ;;  %v130_v24 = vld [vmem:[%s1375_s3 + $0x40] sm:$0xff]  ;;  %v129_v25 = vld [vmem:[%s1375_s3 + $0x38] sm:$0xff]  ;;  %vm453_vm6 = vcmask 15360   ;;  %vm753_vm7 = vcmask 523264  }
   0xe   :  { %902 = vmatprep.subr.mxu1 %v1045_v1  ;;  %v128_v26 = vld [vmem:[%s1375_s3 + $0x30] sm:$0xff]  ;;  %v127_v27 = vld [vmem:[%s1375_s3 + $0x28] sm:$0xff]  ;;  %v126_v28 = vld [vmem:[%s1375_s3 + $0x20] sm:$0xff] }
   0xf   :  { %v225_v20 = vsub.f32 %v216_v3, %v224_v18  ;;  %903 = vmatpush3.msra.mxu1 %v133_v19  ;;  %v125_v29 = vld [vmem:[%s1375_s3 + $0x18] sm:$0xff]  ;;  %v239_v40 = vld [vmem:[%s1378_s6 + $0x8] sm:$0xff]  ;;  %v240_v41 = vld [vmem:[%s1378_s6 + $0x10] sm:$0xff] }
  0x10   :  { %904 = vmatprep.subr.mxu1 %v1045_v1  ;;  %v241_v42 = vld [vmem:[%s1378_s6 + $0x18] sm:$0xff]  ;;  %v242_v43 = vld [vmem:[%s1378_s6 + $0x20] sm:$0xff]  ;;  %v243_v44 = vld [vmem:[%s1378_s6 + $0x28] sm:$0xff] }
  0x11   :  { %v226_v22 = vmul.f32 1.442695, %v225_v20  ;;  %905 = vmatpush3.msra.mxu1 %v132_v21  ;;  %v244_v45 = vld [vmem:[%s1378_s6 + $0x30] sm:$0xff]  ;;  %v245_v46 = vld [vmem:[%s1378_s6 + $0x38] sm:$0xff]  ;;  %v246_v47 = vld [vmem:[%s1378_s6 + $0x40] sm:$0xff] }
  0x12   :  { %906 = vmatprep.subr.mxu1 %v1045_v1  ;;  %v124_v48 = vld [vmem:[%s1375_s3 + $0x10] sm:$0xff]  ;;  %v123_v49 = vld [vmem:[%s1375_s3 + $0x8] sm:$0xff]  ;;  %v122_v52 = vld [vmem:[%s1375_s3] sm:$0xff] }
  0x13   :  { %1019 = vpow2.f32 %v226_v22  ;;  %907 = vmatpush3.msra.mxu1 %v131_v23  ;;  %v247_v50 = vld [vmem:[%s1378_s6 + $0x48] sm:$0xff]  ;;  %v248_v51 = vld [vmem:[%s1378_s6 + $0x50] sm:$0xff]  ;;  %v249_v53 = vld [vmem:[%s1378_s6 + $0x58] sm:$0xff] }
  0x14   :  { %908 = vmatprep.subr.mxu1 %v1045_v1  ;;  %v250_v54 = vld [vmem:[%s1378_s6 + $0x60] sm:$0xff]  ;;  %v251_v55 = vld [vmem:[%s1378_s6 + $0x68] sm:$0xff]  ;;  %v252_v56 = vld [vmem:[%s1378_s6 + $0x70] sm:$0xff] }
  0x15   :  { %909 = vmatpush3.msra.mxu1 %v130_v24  ;;  %v253_v57 = vld [vmem:[%s1378_s6 + $0x78] sm:$0xff]  ;;  %v452_v58 = vld [vmem:[%s1379_s7] sm:$0x3] }
  0x16   :  { %910 = vmatprep.subr.mxu1 %v1045_v1  ;;  %v773_v59 = vld [vmem:[%s1374_s2] ss:$0 sm:$0xff] }
  0x17   :  { %911 = vmatpush3.msra.mxu1 %v129_v25 }
  0x18   :  { %912 = vmatprep.subr.mxu1 %v1045_v1 }
  0x19   :  { %913 = vmatpush3.msra.mxu1 %v128_v26 }
  0x1a   :  { %914 = vmatprep.subr.mxu1 %v1045_v1 }
  0x1b   :  { %915 = vmatpush3.msra.mxu1 %v127_v27 }
  0x1c   :  { %916 = vmatprep.subr.mxu1 %v1045_v1 }
  0x1d   :  { %917 = vmatpush3.msra.mxu1 %v126_v28 }
  0x1e   :  { %918 = vmatprep.subr.mxu1 %v1045_v1 }
  0x1f   :  { %919 = vmatpush3.msra.mxu1 %v125_v29 }
  0x20   :  { %v1020_v30 = vpop.eup %1019  ;;  %920 = vmatprep.subr.mxu1 %v1045_v1 }
  0x21   :  { %v228_v31 = vsel %vm217_vm1, %v1020_v30, 0.0  ;;  %921 = vmatpush3.msra.mxu1 %v124_v48  ;;  %v659_v48 = vld [vmem:[%s1380_s8 + $0x40] sm:$0xff] }
  0x22   :  { %v229_v32 = vrot.slane %v228_v31, 4  ;;  %922 = vmatprep.subr.mxu1 %v1045_v1 }
  0x23   :  { %923 = vmatpush3.msra.mxu1 %v123_v49 }
  0x24   :  { %v230_v33 = vadd.f32 %v229_v32, %v228_v31  ;;  %924 = vmatprep.subr.mxu1 %v1045_v1 }
  0x25   :  { %925 = vmatpush3.msra.mxu1 %v122_v52  ;;  %v657_v52 = vld [vmem:[%s1380_s8 + $0x30] sm:$0xff] }
  0x26   :  { %v231_v34 = vrot.slane %v230_v33, 2  ;;  %955 = vmatprep.subr.msk.mxu1 %vm502_vm5, %v452_v58 }
  0x28   :  { %v232_v35 = vadd.f32 %v231_v34, %v230_v33  ;;  %v666_v33 = vld [vmem:[%s1380_s8 + $0x78] sm:$0xff] }
  0x2a   :  { %v233_v36 = vrot.slane %v232_v35, 1 }
  0x2c   :  { %v234_v37 = vadd.f32 %v233_v36, %v232_v35  ;;  %v665_v35 = vld [vmem:[%s1380_s8 + $0x70] sm:$0xff] }
  0x2e   :  { %1021 = vrcp.f32 %v234_v37  ;;  %v664_v37 = vld [vmem:[%s1380_s8 + $0x68] sm:$0xff] }
  0x3b   :  { %v1022_v38 = vpop.eup %1021 }
  0x3c   :  { %v236_v39 = vmul.f32 %v1022_v38, %v1020_v30 }
  0x3e   :  { %237 = vst.msk [vmem:[%s1382_s10] sm:$0xf] %vm217_vm1, %v236_v39  ;;  %929 = vmatprep.subr.msk.mxu0 %vm303_vm4, %v236_v39 }
  0x3f   :  { %930 = vmatpush3.msk.msra.mxu0 %vm303_vm4, %v236_v39 }
  0x40   :  { %932 = vmatmul.mubr.msk.f32.vlgmr.msra.gmra.mxu0 %vm254_vm3, %v239_v40  ;;  %981 = vmatprep.subr.mxu0 %v1045_v1  ;;  %v663_v40 = vld [vmem:[%s1380_s8 + $0x60] sm:$0xff] }
  0x41   :  { %934 = vmatprep.mubr.msk.f32.mxu0 %vm254_vm3, %v240_v41 }
  0x44   :  { %935 = vmatmul.mubr.msk.f32.gmra.mxu0 %vm254_vm3, %v241_v42  ;;  %v662_v42 = vld [vmem:[%s1380_s8 + $0x58] sm:$0xff] }
  0x45   :  { %937 = vmatprep.mubr.msk.f32.mxu0 %vm254_vm3, %v242_v43 }
  0x48   :  { %938 = vmatmul.mubr.msk.f32.gmra.mxu0 %vm254_vm3, %v243_v44  ;;  %v661_v44 = vld [vmem:[%s1380_s8 + $0x50] sm:$0xff] }
  0x49   :  { %940 = vmatprep.mubr.msk.f32.mxu0 %vm254_vm3, %v244_v45 }
  0x4c   :  { %941 = vmatmul.mubr.msk.f32.gmra.mxu0 %vm254_vm3, %v245_v46  ;;  %v660_v46 = vld [vmem:[%s1380_s8 + $0x48] sm:$0xff] }
  0x4d   :  { %943 = vmatprep.mubr.msk.f32.mxu0 %vm254_vm3, %v246_v47 }
  0x50   :  { %944 = vmatmul.mubr.msk.f32.gmra.mxu0 %vm254_vm3, %v247_v50  ;;  %v658_v50 = vld [vmem:[%s1380_s8 + $0x38] sm:$0xff] }
  0x51   :  { %946 = vmatprep.mubr.msk.f32.mxu0 %vm254_vm3, %v248_v51 }
  0x54   :  { %947 = vmatmul.mubr.msk.f32.gmra.mxu0 %vm254_vm3, %v249_v53 }
  0x55   :  { %949 = vmatprep.mubr.msk.f32.mxu0 %vm254_vm3, %v250_v54  ;;  %v656_v54 = vld [vmem:[%s1380_s8 + $0x28] sm:$0xff] }
  0x58   :  { %950 = vmatmul.mubr.msk.f32.gmra.mxu0 %vm254_vm3, %v251_v55 }
  0x59   :  { %952 = vmatprep.mubr.msk.f32.mxu0 %vm254_vm3, %v252_v56  ;;  %v655_v56 = vld [vmem:[%s1380_s8 + $0x20] sm:$0xff] }
  0x5c   :  { %953 = vmatmul.mubr.msk.f32.gmra.mxu0 %vm254_vm3, %v253_v57 }
  0x5d   :  { %1013 = vmatprep.mubr.msk.f32.mxu0 %vm1046_vm0, %v1045_v1 }
  0xc9   :  { %v117_v60 = vpop.f32.mrf.mxu0 }
  0xca   :  { %v118_v61 = vadd.f32 %v773_v59, %v117_v60  ;;  %v653_v60 = vld [vmem:[%s1380_s8 + $0x10] sm:$0xff] }
  0xcb   :  { %v893_v62 = vpop.f32.mrf.mxu0 }
  0xcc   :  { %v121_v63 = vmax.f32 %v118_v61, 0.0  ;;  %v775_v61 = vld [vmem:[%s1376_s4] ss:$0 sm:$0xff]  ;;  %s1047_s4 = smov [#allocation2]  }
  0xcd   :  { %s761_s25 = sshll.u32 %s1047_s4, 4  ;;  %s762_s25 = int_to_ptr.vmem [resolvable:$true] %s761_s25 }
  0xce   :  { %927 = vmatmul.mubr.f32.vlgmr.msra.gmra.mxu1 %v121_v63  ;;  %v652_v63 = vld [vmem:[%s1380_s8 + $0x8] sm:$0xff]  ;;  %p1028_p1 = scmp.lt.s32.totalorder %s762_s25, %s762_s25 }
  0xcf   :  { %956 = vmatpush3.msk.msra.mxu1 %vm502_vm5, %v452_v58  ;;  %v654_v58 = vld [vmem:[%s1380_s8 + $0x18] sm:$0xff] }
 0x100   :  { %v933_v0 = vpop.f32.mrf.mxu0 }
 0x102   :  { %v373_v2 = vpop.f32.mrf.mxu0 }
 0x103   :  { %957 = vmatprep.mubr.msk.f32.mxu1 %vm453_vm6, %v373_v2 }
 0x104   :  { %v936_v3 = vpop.f32.mrf.mxu0  ;;  %958 = vmatmul.mubr.msk.f32.vlgmr.msra.gmra.mxu1 %vm453_vm6, %v933_v0 }
 0x106   :  { %v383_v4 = vpop.f32.mrf.mxu0 }
 0x107   :  { %960 = vmatprep.mubr.msk.f32.mxu1 %vm453_vm6, %v383_v4 }
 0x108   :  { %v939_v5 = vpop.f32.mrf.mxu0  ;;  %961 = vmatmul.mubr.msk.f32.gmra.mxu1 %vm453_vm6, %v936_v3  ;;  %v651_v3 = vld [vmem:[%s1380_s8] sm:$0xff]  ;;  %s1023_s8 = scalar_lea.vmem %s762_s25, 128 }
 0x109   :  { %p1024_p0 = scmp.ne.s32.totalorder %s762_s25, %s1023_s8  ;;  %p1029_p2 = scmp.lt.s32.totalorder %s1023_s8, %s1023_s8 }
 0x10a   :  { %v393_v6 = vpop.f32.mrf.mxu0 }
 0x10b   :  { %963 = vmatprep.mubr.msk.f32.mxu1 %vm453_vm6, %v393_v6  ;;  %p1030_p3 = por %p1029_p2, %p1028_p1 }
 0x10c   :  { %v942_v7 = vpop.f32.mrf.mxu0  ;;  %964 = vmatmul.mubr.msk.f32.gmra.mxu1 %vm453_vm6, %v939_v5 }
 0x10d   :  { %p1031_p4 = pnand %p1030_p3, %p1024_p0 }
 0x10e   :  { %v403_v8 = vpop.f32.mrf.mxu0 }
 0x10f   :  { %966 = vmatprep.mubr.msk.f32.mxu1 %vm453_vm6, %v403_v8 }
 0x110   :  { %v945_v9 = vpop.f32.mrf.mxu0  ;;  %967 = vmatmul.mubr.msk.f32.gmra.mxu1 %vm453_vm6, %v942_v7 }
 0x112   :  { %v413_v10 = vpop.f32.mrf.mxu0 }
 0x113   :  { %969 = vmatprep.mubr.msk.f32.mxu1 %vm453_vm6, %v413_v10 }
 0x114   :  { %v948_v11 = vpop.f32.mrf.mxu0  ;;  %970 = vmatmul.mubr.msk.f32.gmra.mxu1 %vm453_vm6, %v945_v9 }
 0x116   :  { %v423_v12 = vpop.f32.mrf.mxu0 }
 0x117   :  { %972 = vmatprep.mubr.msk.f32.mxu1 %vm453_vm6, %v423_v12 }
 0x118   :  { %v951_v13 = vpop.f32.mrf.mxu0  ;;  %973 = vmatmul.mubr.msk.f32.gmra.mxu1 %vm453_vm6, %v948_v11 }
 0x11a   :  { %v433_v14 = vpop.f32.mrf.mxu0 }
 0x11b   :  { %975 = vmatprep.mubr.msk.f32.mxu1 %vm453_vm6, %v433_v14 }
 0x11c   :  { %v954_v15 = vpop.f32.mrf.mxu0  ;;  %976 = vmatmul.mubr.msk.f32.gmra.mxu1 %vm453_vm6, %v951_v13 }
 0x11e   :  { %v443_v16 = vpop.f32.mrf.mxu0 }
 0x11f   :  { %978 = vmatprep.mubr.msk.f32.mxu1 %vm453_vm6, %v443_v16 }
 0x120   :  { %979 = vmatmul.mubr.msk.f32.gmra.mxu1 %vm453_vm6, %v954_v15 }
 0x18e   :  { %v1288_v17 = vpop.f32.mrf.mxu1 }
 0x18f   :  { %v212_v2 = vadd.f32 %v775_v61, %v1288_v17 }
 0x190   :  { %v928_v18 = vpop.f32.mrf.mxu1 }
 0x191   :  { %v215_v6 = vmax.f32 %v212_v2, 0.0 }
 0x1c4   :  { %v1290_v19 = vpop.f32.mrf.mxu1 }
 0x1c5   :  { %v668_v4 = vmul.f32 %v1290_v19, %v652_v63 }
 0x1c6   :  { %v1292_v20 = vpop.f32.mrf.mxu1 }
 0x1c7   :  { %v667_v5 = vmul.f32 %v651_v3, %v1292_v20 }
 0x1c8   :  { %v1294_v21 = vpop.f32.mrf.mxu1 }
 0x1c9   :  { %v670_v62 = vmul.f32 %v1294_v21, %v654_v58 }
 0x1ca   :  { %v1296_v22 = vpop.f32.mrf.mxu1 }
 0x1cb   :  { %v669_v0 = vmul.f32 %v653_v60, %v1296_v22 }
 0x1cc   :  { %v965_v23 = vpop.f32.mrf.mxu1 }
 0x1cd   :  { %v672_v57 = vmul.f32 %v965_v23, %v656_v54 }
 0x1ce   :  { %v592_v24 = vpop.f32.mrf.mxu1 }
 0x1cf   :  { %v671_v59 = vmul.f32 %v655_v56, %v592_v24 }
 0x1d0   :  { %v968_v25 = vpop.f32.mrf.mxu1 }
 0x1d1   :  { %v674_v53 = vmul.f32 %v968_v25, %v658_v50 }
 0x1d2   :  { %v602_v26 = vpop.f32.mrf.mxu1 }
 0x1d3   :  { %v673_v55 = vmul.f32 %v657_v52, %v602_v26 }
 0x1d4   :  { %v971_v27 = vpop.f32.mrf.mxu1 }
 0x1d5   :  { %v676_v49 = vmul.f32 %v971_v27, %v660_v46 }
 0x1d6   :  { %v612_v28 = vpop.f32.mrf.mxu1 }
 0x1d7   :  { %v675_v51 = vmul.f32 %v659_v48, %v612_v28 }
 0x1d8   :  { %v974_v29 = vpop.f32.mrf.mxu1 }
 0x1d9   :  { %v678_v45 = vmul.f32 %v974_v29, %v662_v42 }
 0x1da   :  { %v622_v30 = vpop.f32.mrf.mxu1 }
 0x1db   :  { %v677_v47 = vmul.f32 %v661_v44, %v622_v30 }
 0x1dc   :  { %v977_v31 = vpop.f32.mrf.mxu1 }
 0x1dd   :  { %v680_v41 = vmul.f32 %v977_v31, %v664_v37 }
 0x1de   :  { %v632_v32 = vpop.f32.mrf.mxu1 }
 0x1df   :  { %v679_v43 = vmul.f32 %v663_v40, %v632_v32 }
 0x1e0   :  { %v980_v34 = vpop.f32.mrf.mxu1 }
 0x1e1   :  { %v682_v36 = vmul.f32 %v980_v34, %v666_v33 }
 0x1e2   :  { %v642_v38 = vpop.f32.mrf.mxu1 }
 0x1e3   :  { %v681_v39 = vmul.f32 %v665_v35, %v642_v38  ;;  %982 = vmatpush3.msra.mxu0 %v682_v36 }
 0x1e4   :  { %983 = vmatprep.subr.mxu0 %v1045_v1 }
 0x1e5   :  { %984 = vmatpush3.msra.mxu0 %v681_v39 }
 0x1e6   :  { %985 = vmatprep.subr.mxu0 %v1045_v1 }
 0x1e7   :  { %986 = vmatpush3.msra.mxu0 %v680_v41 }
 0x1e8   :  { %987 = vmatprep.subr.mxu0 %v1045_v1 }
 0x1e9   :  { %988 = vmatpush3.msra.mxu0 %v679_v43 }
 0x1ea   :  { %989 = vmatprep.subr.mxu0 %v1045_v1 }
 0x1eb   :  { %990 = vmatpush3.msra.mxu0 %v678_v45 }
 0x1ec   :  { %991 = vmatprep.subr.mxu0 %v1045_v1 }
 0x1ed   :  { %992 = vmatpush3.msra.mxu0 %v677_v47 }
 0x1ee   :  { %993 = vmatprep.subr.mxu0 %v1045_v1 }
 0x1ef   :  { %994 = vmatpush3.msra.mxu0 %v676_v49 }
 0x1f0   :  { %995 = vmatprep.subr.mxu0 %v1045_v1 }
 0x1f1   :  { %996 = vmatpush3.msra.mxu0 %v675_v51 }
 0x1f2   :  { %997 = vmatprep.subr.mxu0 %v1045_v1 }
 0x1f3   :  { %998 = vmatpush3.msra.mxu0 %v674_v53 }
 0x1f4   :  { %999 = vmatprep.subr.mxu0 %v1045_v1 }
 0x1f5   :  { %1000 = vmatpush3.msra.mxu0 %v673_v55 }
 0x1f6   :  { %1001 = vmatprep.subr.mxu0 %v1045_v1 }
 0x1f7   :  { %1002 = vmatpush3.msra.mxu0 %v672_v57 }
 0x1f8   :  { %1003 = vmatprep.subr.mxu0 %v1045_v1 }
 0x1f9   :  { %1004 = vmatpush3.msra.mxu0 %v671_v59 }
 0x1fa   :  { %1005 = vmatprep.subr.mxu0 %v1045_v1 }
 0x1fb   :  { %1006 = vmatpush3.msra.mxu0 %v670_v62 }
 0x1fc   :  { %1007 = vmatprep.subr.mxu0 %v1045_v1 }
 0x1fd   :  { %1008 = vmatpush3.msra.mxu0 %v669_v0 }
 0x1fe   :  { %1009 = vmatprep.subr.mxu0 %v1045_v1 }
 0x1ff   :  { %1010 = vmatpush3.msra.mxu0 %v668_v4 }
 0x200   :  { %1011 = vmatprep.subr.mxu0 %v1045_v1 }
 0x201   :  { %1012 = vmatpush3.msra.mxu0 %v667_v5 }
 0x202   :  { %1014 = vmatmul.mubr.f32.vlgmr.msra.gmra.mxu0 %v215_v6 }
 0x2c2   :  { %v749_v7 = vpop.f32.mrf.mxu0 }
 0x2c3   :  { %754 = vst.msk [vmem:[#allocation2] sm:$0xff] %vm753_vm7, %v749_v7 }
 0x2c4   :  { %v1015_v8 = vpop.f32.mrf.mxu0 }
 0x2c5   :  { %1034 = shalt.err (!%p1031_p4)
}
 0x2c6   :  { %764 = dma.vmem_to_hbm [thread:$0]  %s762_s25, 128, %s1381_s9, [#allocation3]  }
 0x2c7   :  { %1043 = dma.done.wait [#allocation3], 128  }
 0x2c8   :  { %1044 = vsyncadd [#allocation3], 4294967168 }
 0x2c9   :  { %772 = vsyncpa [#allocation3], 1 }

</bundles_post_ra>
